<compile_context>
chip_gen: v7x
topology: tpu7x:2x2x1
jax: 0.10.0
libtpu: 0.0.40
codegen_flags: <defaults>
</compile_context>

<pallas_src>
import functools

import jax
import jax.numpy as jnp
from jax import lax
from jax.experimental import pallas as pl
from jax.experimental.pallas import tpu as pltpu


def _conv3x3_taps_kernel(w_ref, x_ref, o_ref, *, width):
    """One grid step = one branch x `batch_block` images.

    w_ref : (1, 9*Cout, Cin)   per-branch weights, rows ordered (ky, kx, c)
    x_ref : (1, nb, Cin, Lp)   zero-padded, flattened images, Lp=(H+2)*(W+2)+2
    o_ref : (1, nb, Cout, Lout) conv output on the padded-width grid, Lout=H*(W+2)
    """
    wp2 = width + 2
    nb = x_ref.shape[1]
    cout = o_ref.shape[2]
    lout = o_ref.shape[3]

    w_mat = w_ref[0]                                    # (9*Cout, Cin)

    for t in range(nb):
        x_flat = x_ref[0, t]                            # (Cin, Lp)
        # All 9 taps x all Cout channels in a single MXU matmul.
        y = jnp.dot(w_mat, x_flat,
                    preferred_element_type=jnp.float32,
                    precision=lax.Precision.HIGHEST)    # (9*Cout, Lp)
        acc = None
        for ky in range(3):
            for kx in range(3):
                tap = ky * 3 + kx
                off = ky * wp2 + kx                     # constant lane offset
                term = y[tap * cout:(tap + 1) * cout, off:off + lout]
                acc = term if acc is None else acc + term
        o_ref[0, t] = acc.astype(o_ref.dtype)


def downsample3(x_rgb, x_hsv, x_lab, w1, w2, w3, *, batch_block=None):
    """Three branches of Conv2d(C, C//2, 3, s=1, p=1, bias=False) + PixelUnshuffle(2)."""
    N, cin, H, W = x_rgb.shape
    cout = w1.shape[0]
    assert x_hsv.shape == x_rgb.shape and x_lab.shape == x_rgb.shape
    assert w1.shape == (cout, cin, 3, 3)
    assert H % 2 == 0 and W % 2 == 0

    if batch_block is None:
        batch_block = next(d for d in (8, 4, 2, 1) if N % d == 0)
    assert N % batch_block == 0
    nb = batch_block

    lout = H * (W + 2)
    lp = (H + 2) * (W + 2) + 2

    # -------- wrapper-side layout prep (cheap XLA ops, outside the kernel) ----
    x_all = jnp.stack([x_rgb, x_hsv, x_lab], axis=0)               # (3,N,Cin,H,W)
    x_pad = jnp.pad(x_all, ((0, 0), (0, 0), (0, 0), (1, 1), (1, 1)))
    x_flat = x_pad.reshape(3, N, cin, (H + 2) * (W + 2))
    x_flat = jnp.pad(x_flat, ((0, 0), (0, 0), (0, 0), (0, 2)))     # (3,N,Cin,Lp)

    # Weights: rows ordered (ky, kx, c) so row block `tap` of the matmul result
    # holds all Cout channels of that 3x3 tap.
    w_all = jnp.stack([w1, w2, w3], axis=0).astype(jnp.float32)    # (3,Cout,Cin,3,3)
    w_mat = jnp.transpose(w_all, (0, 3, 4, 1, 2)).reshape(3, 9 * cout, cin)

    kernel = functools.partial(_conv3x3_taps_kernel, width=W)

    grid_spec = pltpu.PrefetchScalarGridSpec(
        num_scalar_prefetch=0,
        grid=(3, N // nb),
        in_specs=[
            pl.BlockSpec((1, 9 * cout, cin), lambda b, n: (b, 0, 0)),
            pl.BlockSpec((1, nb, cin, lp), lambda b, n: (b, n, 0, 0)),
        ],
        out_specs=pl.BlockSpec((1, nb, cout, lout), lambda b, n: (b, n, 0, 0)),
    )

    out_flat = pl.pallas_call(
        kernel,
        out_shape=jax.ShapeDtypeStruct((3, N, cout, lout), x_rgb.dtype),
        grid_spec=grid_spec,
        compiler_params=pltpu.CompilerParams(
            dimension_semantics=("parallel", "parallel"),
            vmem_limit_bytes=32 * 1024 * 1024),
    )(w_mat, x_flat)

    # -------- wrapper-side epilogue: drop pad columns + PixelUnshuffle(2) -----
    y = out_flat.reshape(3, N, cout, H, W + 2)[..., :W]            # conv output
    y = y.reshape(3, N, cout, H // 2, 2, W // 2, 2)                # (b,n,c,h2,i,q,j)
    y = jnp.transpose(y, (0, 1, 2, 4, 6, 3, 5))                    # (b,n,c,i,j,h2,q)
    out = y.reshape(3, N, 4 * cout, H // 2, W // 2)
    return out[0], out[1], out[2]


# ---------------- pure-JAX reference (for correctness check only) -------------

def _pixel_unshuffle_2_ref(x):
    N, C, H, W = x.shape
    x = x.reshape(N, C, H // 2, 2, W // 2, 2)
    x = jnp.transpose(x, (0, 1, 3, 5, 2, 4))
    return x.reshape(N, C * 4, H // 2, W // 2)


def _downsample_ref(x, w):
    y = lax.conv_general_dilated(
        x, w, window_strides=(1, 1), padding="SAME",
        dimension_numbers=("NCHW", "OIHW", "NCHW"),
        precision=lax.Precision.HIGHEST)
    return _pixel_unshuffle_2_ref(y)


if __name__ == "__main__":
    key = jax.random.PRNGKey(0)
    N, C, H, W = 2, 4, 16, 16  # Downsample3(c=4)

    k1, k2, k3, k4, k5, k6 = jax.random.split(key, 6)
    x_rgb = jax.random.normal(k1, (N, C, H, W), dtype=jnp.float32)
    x_hsv = jax.random.normal(k2, (N, C, H, W), dtype=jnp.float32)
    x_lab = jax.random.normal(k3, (N, C, H, W), dtype=jnp.float32)

    # Conv weights: (C_out, C_in, 3, 3) with C_out = C // 2.
    fan_in = C * 3 * 3
    bound = 1.0 / (fan_in ** 0.5)
    w1 = jax.random.uniform(k4, (C // 2, C, 3, 3), jnp.float32, -bound, bound)
    w2 = jax.random.uniform(k5, (C // 2, C, 3, 3), jnp.float32, -bound, bound)
    w3 = jax.random.uniform(k6, (C // 2, C, 3, 3), jnp.float32, -bound, bound)

    fwd = jax.jit(functools.partial(downsample3, batch_block=2))
    out_rgb, out_hsv, out_lab = jax.block_until_ready(
        fwd(x_rgb, x_hsv, x_lab, w1, w2, w3))

    expect_shape = (N, (C // 2) * 4, H // 2, W // 2)   # (2, 8, 8, 8)
    assert out_rgb.shape == expect_shape, out_rgb.shape
    assert out_hsv.shape == expect_shape, out_hsv.shape
    assert out_lab.shape == expect_shape, out_lab.shape

    for got, x_in, w_in in ((out_rgb, x_rgb, w1),
                            (out_hsv, x_hsv, w2),
                            (out_lab, x_lab, w3)):
        ref = _downsample_ref(x_in, w_in)
        err = float(jnp.max(jnp.abs(got - ref)))
        assert jnp.allclose(got, ref, atol=1e-3, rtol=1e-3), err

    print("KERNEL_OK")
</pallas_src>

<mosaic_0001>
module attributes {stable_mosaic.version = 11 : i64} {
  func.func @_conv3x3_taps_kernel(%arg0: i32, %arg1: i32, %arg2: memref<1x18x4xf32, #tpu.memory_space<vmem>>, %arg3: memref<1x2x4x326xf32, #tpu.memory_space<vmem>>, %arg4: memref<1x2x2x288xf32, #tpu.memory_space<vmem>>) attributes {dimension_semantics = [#tpu.dimension_semantics<parallel>, #tpu.dimension_semantics<parallel>], iteration_bounds = array<i64: 3, 1>, scalar_prefetch = 0 : i64, scratch_operands = 0 : i64, tpu.core_type = #tpu.core_type<tc>, window_params = [{transform_indices = @transform_0, window_bounds = array<i64: 1, 18, 4>}, {transform_indices = @transform_1, window_bounds = array<i64: 1, 2, 4, 326>}, {transform_indices = @transform_2, window_bounds = array<i64: 1, 2, 2, 288>}]} {
    %c0 = arith.constant 0 : index
    %c0_0 = arith.constant 0 : index
    %c0_1 = arith.constant 0 : index
    %0 = vector.load %arg2[%c0, %c0_0, %c0_1] : memref<1x18x4xf32, #tpu.memory_space<vmem>>, vector<1x18x4xf32>
    %1 = vector.shape_cast %0 : vector<1x18x4xf32> to vector<18x4xf32>
    %c0_2 = arith.constant 0 : index
    %c0_3 = arith.constant 0 : index
    %c0_4 = arith.constant 0 : index
    %c0_5 = arith.constant 0 : index
    %2 = vector.load %arg3[%c0_2, %c0_3, %c0_4, %c0_5] : memref<1x2x4x326xf32, #tpu.memory_space<vmem>>, vector<1x1x4x326xf32>
    %3 = vector.shape_cast %2 : vector<1x1x4x326xf32> to vector<4x326xf32>
    %cst = arith.constant dense<0.000000e+00> : vector<18x326xf32>
    %4 = tpu.matmul %1, %3, %cst {dimension_numbers = #tpu.dot_dimension_numbers<[1], [0], [0], [1], [0, 0, 1, 1], [], []>, precision = #tpu.contract_precision<fp32>} : vector<18x4xf32>, vector<4x326xf32>, vector<18x326xf32> -> vector<18x326xf32>
    %5 = vector.extract_strided_slice %4 {offsets = [0, 0], sizes = [2, 288], strides = [1, 1]} : vector<18x326xf32> to vector<2x288xf32>
    %6 = vector.extract_strided_slice %4 {offsets = [2, 1], sizes = [2, 288], strides = [1, 1]} : vector<18x326xf32> to vector<2x288xf32>
    %7 = arith.addf %5, %6 : vector<2x288xf32>
    %8 = vector.extract_strided_slice %4 {offsets = [4, 2], sizes = [2, 288], strides = [1, 1]} : vector<18x326xf32> to vector<2x288xf32>
    %9 = arith.addf %7, %8 : vector<2x288xf32>
    %10 = vector.extract_strided_slice %4 {offsets = [6, 18], sizes = [2, 288], strides = [1, 1]} : vector<18x326xf32> to vector<2x288xf32>
    %11 = arith.addf %9, %10 : vector<2x288xf32>
    %12 = vector.extract_strided_slice %4 {offsets = [8, 19], sizes = [2, 288], strides = [1, 1]} : vector<18x326xf32> to vector<2x288xf32>
    %13 = arith.addf %11, %12 : vector<2x288xf32>
    %14 = vector.extract_strided_slice %4 {offsets = [10, 20], sizes = [2, 288], strides = [1, 1]} : vector<18x326xf32> to vector<2x288xf32>
    %15 = arith.addf %13, %14 : vector<2x288xf32>
    %16 = vector.extract_strided_slice %4 {offsets = [12, 36], sizes = [2, 288], strides = [1, 1]} : vector<18x326xf32> to vector<2x288xf32>
    %17 = arith.addf %15, %16 : vector<2x288xf32>
    %18 = vector.extract_strided_slice %4 {offsets = [14, 37], sizes = [2, 288], strides = [1, 1]} : vector<18x326xf32> to vector<2x288xf32>
    %19 = arith.addf %17, %18 : vector<2x288xf32>
    %20 = vector.extract_strided_slice %4 {offsets = [16, 38], sizes = [2, 288], strides = [1, 1]} : vector<18x326xf32> to vector<2x288xf32>
    %21 = arith.addf %19, %20 : vector<2x288xf32>
    %c0_6 = arith.constant 0 : index
    %c0_7 = arith.constant 0 : index
    %c0_8 = arith.constant 0 : index
    %c0_9 = arith.constant 0 : index
    %22 = vector.load %arg4[%c0_6, %c0_7, %c0_8, %c0_9] : memref<1x2x2x288xf32, #tpu.memory_space<vmem>>, vector<1x1x2x288xf32>
    %23 = vector.shape_cast %22 : vector<1x1x2x288xf32> to vector<2x288xf32>
    %24 = vector.shape_cast %21 : vector<2x288xf32> to vector<1x1x2x288xf32>
    tpu.vector_store %arg4[%c0_6, %c0_7, %c0_8, %c0_9], %24 {strides = array<i32>} : memref<1x2x2x288xf32, #tpu.memory_space<vmem>>, vector<1x1x2x288xf32>,
    %c0_10 = arith.constant 0 : index
    %c1 = arith.constant 1 : index
    %c0_11 = arith.constant 0 : index
    %c0_12 = arith.constant 0 : index
    %25 = vector.load %arg3[%c0_10, %c1, %c0_11, %c0_12] : memref<1x2x4x326xf32, #tpu.memory_space<vmem>>, vector<1x1x4x326xf32>
    %26 = vector.shape_cast %25 : vector<1x1x4x326xf32> to vector<4x326xf32>
    %cst_13 = arith.constant dense<0.000000e+00> : vector<18x326xf32>
    %27 = tpu.matmul %1, %26, %cst_13 {dimension_numbers = #tpu.dot_dimension_numbers<[1], [0], [0], [1], [0, 0, 1, 1], [], []>, precision = #tpu.contract_precision<fp32>} : vector<18x4xf32>, vector<4x326xf32>, vector<18x326xf32> -> vector<18x326xf32>
    %28 = vector.extract_strided_slice %27 {offsets = [0, 0], sizes = [2, 288], strides = [1, 1]} : vector<18x326xf32> to vector<2x288xf32>
    %29 = vector.extract_strided_slice %27 {offsets = [2, 1], sizes = [2, 288], strides = [1, 1]} : vector<18x326xf32> to vector<2x288xf32>
    %30 = arith.addf %28, %29 : vector<2x288xf32>
    %31 = vector.extract_strided_slice %27 {offsets = [4, 2], sizes = [2, 288], strides = [1, 1]} : vector<18x326xf32> to vector<2x288xf32>
    %32 = arith.addf %30, %31 : vector<2x288xf32>
    %33 = vector.extract_strided_slice %27 {offsets = [6, 18], sizes = [2, 288], strides = [1, 1]} : vector<18x326xf32> to vector<2x288xf32>
    %34 = arith.addf %32, %33 : vector<2x288xf32>
    %35 = vector.extract_strided_slice %27 {offsets = [8, 19], sizes = [2, 288], strides = [1, 1]} : vector<18x326xf32> to vector<2x288xf32>
    %36 = arith.addf %34, %35 : vector<2x288xf32>
    %37 = vector.extract_strided_slice %27 {offsets = [10, 20], sizes = [2, 288], strides = [1, 1]} : vector<18x326xf32> to vector<2x288xf32>
    %38 = arith.addf %36, %37 : vector<2x288xf32>
    %39 = vector.extract_strided_slice %27 {offsets = [12, 36], sizes = [2, 288], strides = [1, 1]} : vector<18x326xf32> to vector<2x288xf32>
    %40 = arith.addf %38, %39 : vector<2x288xf32>
    %41 = vector.extract_strided_slice %27 {offsets = [14, 37], sizes = [2, 288], strides = [1, 1]} : vector<18x326xf32> to vector<2x288xf32>
    %42 = arith.addf %40, %41 : vector<2x288xf32>
    %43 = vector.extract_strided_slice %27 {offsets = [16, 38], sizes = [2, 288], strides = [1, 1]} : vector<18x326xf32> to vector<2x288xf32>
    %44 = arith.addf %42, %43 : vector<2x288xf32>
    %c0_14 = arith.constant 0 : index
    %c1_15 = arith.constant 1 : index
    %c0_16 = arith.constant 0 : index
    %c0_17 = arith.constant 0 : index
    %45 = vector.load %arg4[%c0_14, %c1_15, %c0_16, %c0_17] : memref<1x2x2x288xf32, #tpu.memory_space<vmem>>, vector<1x1x2x288xf32>
    %46 = vector.shape_cast %45 : vector<1x1x2x288xf32> to vector<2x288xf32>
    %47 = vector.shape_cast %44 : vector<2x288xf32> to vector<1x1x2x288xf32>
    tpu.vector_store %arg4[%c0_14, %c1_15, %c0_16, %c0_17], %47 {strides = array<i32>} : memref<1x2x2x288xf32, #tpu.memory_space<vmem>>, vector<1x1x2x288xf32>,
    return
  }
  func.func @transform_0(%arg0: i32, %arg1: i32) -> (i32, i32, i32) {
    %c0_i32 = arith.constant 0 : i32
    %c0_i32_0 = arith.constant 0 : i32
    %c0_i32_1 = arith.constant 0 : i32
    return %arg0, %c0_i32, %c0_i32_0 : i32, i32, i32
  }
  func.func @transform_1(%arg0: i32, %arg1: i32) -> (i32, i32, i32, i32) {
    %c0_i32 = arith.constant 0 : i32
    %c0_i32_0 = arith.constant 0 : i32
    %c0_i32_1 = arith.constant 0 : i32
    return %arg0, %arg1, %c0_i32, %c0_i32_0 : i32, i32, i32, i32
  }
  func.func @transform_2(%arg0: i32, %arg1: i32) -> (i32, i32, i32, i32) {
    %c0_i32 = arith.constant 0 : i32
    %c0_i32_0 = arith.constant 0 : i32
    %c0_i32_1 = arith.constant 0 : i32
    return %arg0, %arg1, %c0_i32, %c0_i32_0 : i32, i32, i32, i32
  }
}

</mosaic_0001>

<bundles_post_ra>
// kernel: downsample3.1
= control target key start
LH: loop header
LB: loop body
LE: loop exit
PB: predicated region body
PF: predicated region fallthrough
CT: control target
= control target key end

     0   :  { %s3279_s9 = smov 0   ;;  %s3281_s10 = smov 0   ;;  %s3778_s0 = inlined_call_operand.vmem [shape: f32[3,18,4], index: 0, kind: input, shape index: {}]   ;;  %s3779_s1 = inlined_call_operand.vmem [shape: f32[3,2,4,326], index: 1, kind: input, shape index: {}]   ;;  %s3780_s2 = inlined_call_operand.vmem [shape: f32[3,2,2,288], index: 2, kind: output, shape index: {}]  }
   0x1   :  { %s3283_s11 = smov 0  }
   0x2 LB: > { %s24_s12 = sadd.s32 1, %s3247_s10  ;;  %p2881_p0 = scmp.ge.s32.totalorder %s3251_s11, 1  ;;  %s3251_s11 = sphi %s3283_s11, %s12_s11   ;;  %s3247_s10 = sphi %s3281_s10, %s3784_s10   ;;  %s3243_s9 = sphi %s3279_s9, %s3783_s9  }
   0x3   : > { %p26_p1 = scmp.ge.s32.totalorder %s24_s12, 3  ;;  %p144_p2 = scmp.lt.s32.totalorder %s3251_s11, 4 }
   0x5   : > { %s3786_s12 = smov (%p26_p1, %s24_s12), 0  ;;  %p145_p3 = pnand %p2881_p0, %p144_p2 }
   0x6   : > { %p181_p4 = scmp.lt.s32.totalorder (!%p145_p3), %s3243_s9, 2  ;;  %v3253_v0 = vmov (!%p145_p3), 0.0   ;;  %vm3254_vm0 = vmmov (!%p145_p3), 0   ;;  %vm216_vm1 = vcmask (!%p145_p3), 31744   ;;  %vm226_vm2 = vcmask (!%p145_p3), 1043456   ;;  %s3255_s20 = smov (!%p145_p3), 127  }
   0x7   : > { %148 = sbr.rel (%p145_p3) target bundleno = 558 (0x22e), region = 28  ;;  %2938 = vmatprep.subr.mxu1 (!%p145_p3), %v3253_v0  ;;  %299 = vmatprep.mubr.f32.mxu0 (!%p145_p3), %v3253_v0  ;;  %s3256_s21 = smov (!%p145_p3), 126   ;;  %vm1340_vm3 = vcmask (!%p145_p3), 1039360   ;;  %vm1358_vm4 = vcmask (!%p145_p3), 1031168   ;;  %vm1376_vm5 = vcmask (!%p145_p3), 900096   ;;  %vm1394_vm6 = vcmask (!%p145_p3), 891904  }
   0x8   : > { %2940 = vmatprep.mubr.msk.f32.mxu1 (!%p145_p3), %vm3254_vm0, %v3253_v0  ;;  %s3257_s22 = smov (!%p145_p3), 110   ;;  %s3258_s23 = smov (!%p145_p3), 109   ;;  %vm1412_vm7 = vcmask (!%p145_p3), 883712   ;;  %vm1430_vm8 = vcmask (!%p145_p3), 752640   ;;  %vm1448_vm9 = vcmask (!%p145_p3), 744448   ;;  %vm1466_vm10 = vcmask (!%p145_p3), 736256  }
   0x9   : > { %s3259_s24 = smov (!%p145_p3), 108   ;;  %s3260_s25 = smov (!%p145_p3), 92   ;;  %vm1495_vm11 = vcmask (!%p145_p3), 1041408   ;;  %vm1496_vm12 = vcmask (!%p145_p3), 1043458   ;;  %vm1498_vm14 = vcmask (!%p145_p3), 259076  }
   0xa   : > { %s3261_s26 = smov (!%p145_p3), 91   ;;  %s3262_s27 = smov (!%p145_p3), 90   ;;  %vm1497_vm13 = vmor (!%p145_p3), %vm1496_vm12, %vm1495_vm11 }
   0xb   : > { %vm3738_vm15 = vmor (!%p145_p3), %vm1498_vm14, %vm1497_vm13 }
   0xe   : > { %s3788_s9 = smov (!%p181_p4, %s3243_s9), 2 }
   0xf   : > { %s3190_s13 = smul.u32 24, %s3788_s9 }
  0x10   : > { %s3191_s28 = smul.u32 12, %s3788_s9 }
  0x11   : > { %s185_s16 = scalar_lea.vmem %s3778_s0, %s3190_s13  ;;  %s3310_s19 = scalar_lea.vmem %s3779_s1, %s3190_s13 }
  0x12   : > { %v208_v1 = vld [vmem:[%s185_s16] sm:$0xff]  ;;  %v209_v2 = vld [vmem:[%s185_s16 + $0x8] sm:$0xff]  ;;  %v210_v3 = vld [vmem:[%s185_s16 + $0x10] sm:$0x3]  ;;  %s3736_s3 = scalar_lea.vmem %s3780_s2, %s3191_s28 }
  0x13   : > { %v211_v4 = vld [vmem:[%s3310_s19] sm:$0xff]  ;;  %v218_v5 = vsel %vm216_vm1, %v208_v1, 0  ;;  %v221_v6 = vsel %vm216_vm1, %v209_v2, 0  ;;  %v224_v7 = vsel %vm216_vm1, %v210_v3, 0  ;;  %v212_v8 = vld [vmem:[%s3310_s19 + $0x8] sm:$0xf] }
  0x14   : > { %v215_v9 = vcombine.high %v211_v4, %v211_v4  ;;  %v3314_v10 = vand.u32 4294901760, %v218_v5  ;;  %v3316_v11 = vand.u32 4294901760, %v221_v6  ;;  %v3318_v12 = vand.u32 4294901760, %v224_v7  ;;  %v2886_v22 = vld [vmem:[%s3310_s19 + $0x14] sm:$0xf]  ;;  %v2885_v45 = vld [vmem:[%s3310_s19 + $0xc] sm:$0xff] }
  0x15   : > { %v227_v13 = vsel %vm226_vm2, %v211_v4, 0  ;;  %v231_v14 = vsel %vm226_vm2, %v212_v8, 0  ;;  %v3364_v31 = vsel %vm226_vm2, %v2886_v22, 0  ;;  %v1506_v46 = vcombine.high %v2885_v45, %v2885_v45 }
  0x16   : > { %v229_v15 = vsel %vm226_vm2, %v215_v9, 0  ;;  %v3324_v16 = vsub.f32 %v218_v5, %v3314_v10  ;;  %v3327_v17 = vsub.f32 %v221_v6, %v3316_v11  ;;  %v3330_v18 = vsub.f32 %v224_v7, %v3318_v12 }
  0x17   : > { %v3332_v19 = vand.u32 4294901760, %v229_v15  ;;  %v3334_v20 = vand.u32 4294901760, %v227_v13  ;;  %v3336_v21 = vand.u32 4294901760, %v231_v14  ;;  %v1509_v47 = vsel %vm226_vm2, %v1506_v46, 0 }
  0x18   : > { %v3340_v23 = vand.u32 4294901760, %v3324_v16  ;;  %v3343_v24 = vand.u32 4294901760, %v3327_v17  ;;  %v3361_v30 = vand.u32 4294901760, %v3330_v18  ;;  %v3457_v48 = vand.u32 4294901760, %v1509_v47 }
  0x19   : > { %234 = vmatprep.subr.mxu0 %v3332_v19  ;;  %v3347_v25 = vsub.f32 %v227_v13, %v3334_v20  ;;  %2939 = vmatpush3.msra.mxu1 %v3336_v21  ;;  %v3351_v26 = vsub.f32 %v231_v14, %v3336_v21  ;;  %v334_v27 = vsub.f32 %v229_v15, %v3332_v19  ;;  %v1507_v51 = vsel %vm226_vm2, %v2885_v45, 0 }
  0x1a   : > { %236 = vmatpush1.msra.mxu0 %v3334_v20  ;;  %v303_v28 = vsub.f32 %v3324_v16, %v3340_v23  ;;  %v314_v29 = vsub.f32 %v3327_v17, %v3343_v24  ;;  %2949 = vmatprep.subr.mxu1 %v3253_v0  ;;  %v325_v40 = vsub.f32 %v3330_v18, %v3361_v30  ;;  %v3483_v53 = vand.u32 4294901760, %v1507_v51 }
  0x1b   : > { %v335_v32 = vand.u32 4294901760, %v334_v27  ;;  %v341_v33 = vand.u32 4294901760, %v3347_v25  ;;  %v895_v34 = vand.u32 4294901760, %v3351_v26  ;;  %v3461_v49 = vsub.f32 %v1509_v47, %v3457_v48 }
  0x1c   : > { %v3368_v35 = vand.u32 4294901760, %v303_v28  ;;  %v3378_v39 = vand.u32 4294901760, %v314_v29  ;;  %v3386_v44 = vand.u32 4294901760, %v325_v40  ;;  %v3489_v54 = vand.u32 4294901760, %v3364_v31 }
  0x1d   : > { %v336_v36 = vsub.f32 %v334_v27, %v335_v32  ;;  %v342_v37 = vsub.f32 %v3347_v25, %v341_v33  ;;  %v896_v38 = vsub.f32 %v3351_v26, %v895_v34  ;;  %v1615_v50 = vand.u32 4294901760, %v3461_v49 }
  0x1e   : > { %305 = vmatmul.mubr.f32.vlgmr.msra.gmra.mrb[0].mxu0 %v3368_v35  ;;  %2941 = vmatmul.mubr.f32.vlgmr.msra.gmra.mrb[0].mxu1 %v3368_v35  ;;  %v3493_v55 = vsub.f32 %v1507_v51, %v3483_v53  ;;  %v3497_v56 = vsub.f32 %v3364_v31, %v3489_v54 }
  0x1f   : > { %v337_v41 = vand.u32 4294901760, %v336_v36  ;;  %310 = vmatprep.mubr.f32.mxu0 %v3253_v0  ;;  %v343_v42 = vand.u32 4294901760, %v342_v37  ;;  %2943 = vmatprep.mubr.msk.f32.mxu1 %vm3254_vm0, %v3253_v0  ;;  %v897_v43 = vand.u32 4294901760, %v896_v38  ;;  %v1616_v52 = vsub.f32 %v3461_v49, %v1615_v50 }
  0x20   : > { %v1621_v58 = vand.u32 4294901760, %v3493_v55  ;;  %v2175_v59 = vand.u32 4294901760, %v3497_v56 }
  0x21   : > { %338 = vmatprep.subr.mxu0 %v337_v41  ;;  %2950 = vmatpush3.msra.mxu1 %v897_v43  ;;  %v1617_v57 = vand.u32 4294901760, %v1616_v52 }
  0x22   : > { %344 = vmatpush1.msra.mxu0 %v343_v42  ;;  %2944 = vmatmul.mubr.f32.gmra.mrb[2].mxu1 %v3378_v39  ;;  %v1622_v60 = vsub.f32 %v3493_v55, %v1621_v58  ;;  %v2176_v61 = vsub.f32 %v3497_v56, %v2175_v59 }
  0x23   : > { %316 = vmatmul.mubr.f32.gmra.mrb[2].mxu0 %v3378_v39  ;;  %2946 = vmatprep.mubr.msk.f32.mxu1 %vm3254_vm0, %v3253_v0 }
  0x24   : > { %321 = vmatprep.mubr.f32.mxu0 %v3253_v0  ;;  %431 = vmatprep.subr.mxu0 %v334_v27  ;;  %v1623_v62 = vand.u32 4294901760, %v1622_v60  ;;  %v2177_v63 = vand.u32 4294901760, %v2176_v61 }
  0x25   : > { %2960 = vmatprep.subr.mxu1 %v3253_v0 }
  0x26   : > { %2947 = vmatmul.mubr.f32.gmra.mrb[4].mxu1 %v3386_v44 }
  0x27   : > { %327 = vmatmul.mubr.f32.gmra.mrb[4].mxu0 %v3386_v44  ;;  %2951 = vmatprep.mubr.msk.f32.mxu1 %vm3254_vm0, %v3253_v0 }
  0x28   : > { %407 = vmatprep.mubr.f32.mxu0 %v3253_v0 }
  0x2a   : > { %2952 = vmatmul.mubr.f32.vlgmr.msra.gmra.mrb[0].mxu1 %v3314_v10 }
  0x2b   : > { %409 = vmatmul.mubr.f32.vlgmr.msra.gmra.mrb[0].mxu0 %v3314_v10  ;;  %2954 = vmatprep.mubr.msk.f32.mxu1 %vm3254_vm0, %v3253_v0 }
  0x2c   : > { %414 = vmatprep.mubr.f32.mxu0 %v3253_v0  ;;  %434 = vmatpush1.msra.mxu0 %v3347_v25 }
  0x2d   : > { %2961 = vmatpush3.msra.mxu1 %v3351_v26  ;;  %523 = vmatprep.subr.mxu0 %v3332_v19 }
  0x2e   : > { %2955 = vmatmul.mubr.f32.gmra.mrb[2].mxu1 %v3316_v11  ;;  %2971 = vmatprep.subr.mxu1 %v3253_v0 }
  0x2f   : > { %416 = vmatmul.mubr.f32.gmra.mrb[2].mxu0 %v3316_v11  ;;  %2957 = vmatprep.mubr.msk.f32.mxu1 %vm3254_vm0, %v3253_v0 }
  0x30   : > { %421 = vmatprep.mubr.f32.mxu0 %v3253_v0 }
  0x32   : > { %2958 = vmatmul.mubr.f32.gmra.mrb[4].mxu1 %v3318_v12 }
  0x33   : > { %423 = vmatmul.mubr.f32.gmra.mrb[4].mxu0 %v3318_v12  ;;  %2962 = vmatprep.mubr.msk.f32.mxu1 %vm3254_vm0, %v3253_v0 }
  0x34   : > { %497 = vmatprep.mubr.f32.mxu0 %v3253_v0 }
  0x36   : > { %2963 = vmatmul.mubr.f32.vlgmr.msra.gmra.mrb[0].mxu1 %v3324_v16 }
  0x37   : > { %500 = vmatmul.mubr.f32.vlgmr.msra.gmra.mrb[0].mxu0 %v3324_v16  ;;  %2965 = vmatprep.mubr.msk.f32.mxu1 %vm3254_vm0, %v3253_v0 }
  0x38   : > { %505 = vmatprep.mubr.f32.mxu0 %v3253_v0  ;;  %525 = vmatpush1.msra.mxu0 %v3334_v20 }
  0x39   : > { %2972 = vmatpush3.msra.mxu1 %v3336_v21  ;;  %619 = vmatprep.subr.mxu0 %v335_v32 }
  0x3a   : > { %2966 = vmatmul.mubr.f32.gmra.mrb[2].mxu1 %v3327_v17  ;;  %2982 = vmatprep.subr.mxu1 %v3253_v0 }
  0x3b   : > { %508 = vmatmul.mubr.f32.gmra.mrb[2].mxu0 %v3327_v17  ;;  %2968 = vmatprep.mubr.msk.f32.mxu1 %vm3254_vm0, %v3253_v0 }
  0x3c   : > { %513 = vmatprep.mubr.f32.mxu0 %v3253_v0 }
  0x3e   : > { %2969 = vmatmul.mubr.f32.gmra.mrb[4].mxu1 %v3330_v18 }
  0x3f   : > { %516 = vmatmul.mubr.f32.gmra.mrb[4].mxu0 %v3330_v18  ;;  %2973 = vmatprep.mubr.msk.f32.mxu1 %vm3254_vm0, %v3253_v0 }
  0x40   : > { %588 = vmatprep.mubr.f32.mxu0 %v3253_v0 }
  0x42   : > { %2974 = vmatmul.mubr.f32.vlgmr.msra.gmra.mrb[0].mxu1 %v3340_v23 }
  0x43   : > { %592 = vmatmul.mubr.f32.vlgmr.msra.gmra.mrb[0].mxu0 %v3340_v23  ;;  %2976 = vmatprep.mubr.msk.f32.mxu1 %vm3254_vm0, %v3253_v0 }
  0x44   : > { %597 = vmatprep.mubr.f32.mxu0 %v3253_v0  ;;  %623 = vmatpush1.msra.mxu0 %v341_v33 }
  0x45   : > { %2983 = vmatpush3.msra.mxu1 %v895_v34  ;;  %709 = vmatprep.subr.mxu0 %v3332_v19 }
  0x46   : > { %2977 = vmatmul.mubr.f32.gmra.mrb[2].mxu1 %v3343_v24  ;;  %2993 = vmatprep.subr.mxu1 %v3253_v0 }
  0x47   : > { %601 = vmatmul.mubr.f32.gmra.mrb[2].mxu0 %v3343_v24  ;;  %2979 = vmatprep.mubr.msk.f32.mxu1 %vm3254_vm0, %v3253_v0 }
  0x48   : > { %606 = vmatprep.mubr.f32.mxu0 %v3253_v0 }
  0x4a   : > { %2980 = vmatmul.mubr.f32.gmra.mrb[4].mxu1 %v3361_v30 }
  0x4b   : > { %610 = vmatmul.mubr.f32.gmra.mrb[4].mxu0 %v3361_v30  ;;  %2984 = vmatprep.mubr.msk.f32.mxu1 %vm3254_vm0, %v3253_v0 }
  0x4c   : > { %686 = vmatprep.mubr.f32.mxu0 %v3253_v0 }
  0x4e   : > { %2985 = vmatmul.mubr.f32.vlgmr.msra.gmra.mrb[0].mxu1 %v3314_v10 }
  0x4f   : > { %688 = vmatmul.mubr.f32.vlgmr.msra.gmra.mrb[0].mxu0 %v3314_v10  ;;  %2987 = vmatprep.mubr.msk.f32.mxu1 %vm3254_vm0, %v3253_v0 }
  0x50   : > { %693 = vmatprep.mubr.f32.mxu0 %v3253_v0  ;;  %711 = vmatpush1.msra.mxu0 %v3334_v20 }
  0x51   : > { %2994 = vmatpush3.msra.mxu1 %v3336_v21  ;;  %1514 = vmatprep.subr.mxu0 %v3457_v48 }
  0x52   : > { %2988 = vmatmul.mubr.f32.gmra.mrb[2].mxu1 %v3316_v11  ;;  %3004 = vmatprep.subr.mxu1 %v3253_v0 }
  0x53   : > { %695 = vmatmul.mubr.f32.gmra.mrb[2].mxu0 %v3316_v11  ;;  %2990 = vmatprep.mubr.msk.f32.mxu1 %vm3254_vm0, %v3253_v0 }
  0x54   : > { %700 = vmatprep.mubr.f32.mxu0 %v3253_v0 }
  0x56   : > { %2991 = vmatmul.mubr.f32.gmra.mrb[4].mxu1 %v3318_v12 }
  0x57   : > { %702 = vmatmul.mubr.f32.gmra.mrb[4].mxu0 %v3318_v12  ;;  %2995 = vmatprep.mubr.msk.f32.mxu1 %vm3254_vm0, %v3253_v0 }
  0x58   : > { %774 = vmatprep.mubr.f32.mxu0 %v3253_v0 }
  0x5a   : > { %2996 = vmatmul.mubr.f32.vlgmr.msra.gmra.mrb[0].mxu1 %v3314_v10 }
  0x5b   : > { %776 = vmatmul.mubr.f32.vlgmr.msra.gmra.mrb[0].mxu0 %v3314_v10  ;;  %2998 = vmatprep.mubr.msk.f32.mxu1 %vm3254_vm0, %v3253_v0 }
  0x5c   : > { %781 = vmatprep.mubr.f32.mxu0 %v3253_v0  ;;  %1516 = vmatpush1.msra.mxu0 %v3483_v53 }
  0x5d   : > { %3005 = vmatpush3.msra.mxu1 %v3489_v54  ;;  %1618 = vmatprep.subr.mxu0 %v1617_v57 }
  0x5e   : > { %2999 = vmatmul.mubr.f32.gmra.mrb[2].mxu1 %v3316_v11  ;;  %3015 = vmatprep.subr.mxu1 %v3253_v0 }
  0x5f   : > { %783 = vmatmul.mubr.f32.gmra.mrb[2].mxu0 %v3316_v11  ;;  %3001 = vmatprep.mubr.msk.f32.mxu1 %vm3254_vm0, %v3253_v0 }
  0x60   : > { %788 = vmatprep.mubr.f32.mxu0 %v3253_v0 }
  0x62   : > { %3002 = vmatmul.mubr.f32.gmra.mrb[4].mxu1 %v3318_v12 }
  0x63   : > { %790 = vmatmul.mubr.f32.gmra.mrb[4].mxu0 %v3318_v12  ;;  %3006 = vmatprep.mubr.msk.f32.mxu1 %vm3254_vm0, %v3253_v0 }
  0x64   : > { %1579 = vmatprep.mubr.f32.mxu0 %v3253_v0 }
  0x66   : > { %3007 = vmatmul.mubr.f32.vlgmr.msra.gmra.mrb[6].mxu1 %v3368_v35 }
  0x67   : > { %1585 = vmatmul.mubr.f32.vlgmr.msra.gmra.mrb[6].mxu0 %v3368_v35  ;;  %3009 = vmatprep.mubr.msk.f32.mxu1 %vm3254_vm0, %v3253_v0 }
  0x68   : > { %1590 = vmatprep.mubr.f32.mxu0 %v3253_v0  ;;  %1624 = vmatpush1.msra.mxu0 %v1623_v62 }
  0x69   : > { %3016 = vmatpush3.msra.mxu1 %v2177_v63  ;;  %1711 = vmatprep.subr.mxu0 %v3461_v49 }
  0x6a   : > { %3010 = vmatmul.mubr.f32.gmra.mrb[8].mxu1 %v3378_v39  ;;  %3026 = vmatprep.subr.mxu1 %v3253_v0 }
  0x6b   : > { %1596 = vmatmul.mubr.f32.gmra.mrb[8].mxu0 %v3378_v39  ;;  %3012 = vmatprep.mubr.msk.f32.mxu1 %vm3254_vm0, %v3253_v0 }
  0x6c   : > { %1601 = vmatprep.mubr.f32.mxu0 %v3253_v0 }
  0x6e   : > { %3013 = vmatmul.mubr.f32.gmra.mrb[10].mxu1 %v3386_v44 }
  0x6f   : > { %1607 = vmatmul.mubr.f32.gmra.mrb[10].mxu0 %v3386_v44  ;;  %3017 = vmatprep.mubr.msk.f32.mxu1 %vm3254_vm0, %v3253_v0 }
  0x70   : > { %1687 = vmatprep.mubr.f32.mxu0 %v3253_v0 }
  0x72   : > { %3018 = vmatmul.mubr.f32.vlgmr.msra.gmra.mrb[6].mxu1 %v3314_v10 }
  0x73   : > { %1689 = vmatmul.mubr.f32.vlgmr.msra.gmra.mrb[6].mxu0 %v3314_v10  ;;  %3020 = vmatprep.mubr.msk.f32.mxu1 %vm3254_vm0, %v3253_v0 }
  0x74   : > { %1694 = vmatprep.mubr.f32.mxu0 %v3253_v0  ;;  %1714 = vmatpush1.msra.mxu0 %v3493_v55 }
  0x75   : > { %3027 = vmatpush3.msra.mxu1 %v3497_v56  ;;  %1803 = vmatprep.subr.mxu0 %v3457_v48 }
  0x76   : > { %3021 = vmatmul.mubr.f32.gmra.mrb[8].mxu1 %v3316_v11  ;;  %3037 = vmatprep.subr.mxu1 %v3253_v0 }
  0x77   : > { %1696 = vmatmul.mubr.f32.gmra.mrb[8].mxu0 %v3316_v11  ;;  %3023 = vmatprep.mubr.msk.f32.mxu1 %vm3254_vm0, %v3253_v0 }
  0x78   : > { %1701 = vmatprep.mubr.f32.mxu0 %v3253_v0 }
  0x7a   : > { %3024 = vmatmul.mubr.f32.gmra.mrb[10].mxu1 %v3318_v12 }
  0x7b   : > { %1703 = vmatmul.mubr.f32.gmra.mrb[10].mxu0 %v3318_v12  ;;  %3028 = vmatprep.mubr.msk.f32.mxu1 %vm3254_vm0, %v3253_v0 }
  0x7c   : > { %1777 = vmatprep.mubr.f32.mxu0 %v3253_v0 }
  0x7e   : > { %3029 = vmatmul.mubr.f32.vlgmr.msra.gmra.mrb[6].mxu1 %v3324_v16 }
  0x7f   : > { %1780 = vmatmul.mubr.f32.vlgmr.msra.gmra.mrb[6].mxu0 %v3324_v16  ;;  %3031 = vmatprep.mubr.msk.f32.mxu1 %vm3254_vm0, %v3253_v0 }
  0x80   : > { %1785 = vmatprep.mubr.f32.mxu0 %v3253_v0  ;;  %1805 = vmatpush1.msra.mxu0 %v3483_v53 }
  0x81   : > { %3038 = vmatpush3.msra.mxu1 %v3489_v54  ;;  %1899 = vmatprep.subr.mxu0 %v1615_v50 }
  0x82   : > { %3032 = vmatmul.mubr.f32.gmra.mrb[8].mxu1 %v3327_v17  ;;  %3048 = vmatprep.subr.mxu1 %v3253_v0 }
  0x83   : > { %1788 = vmatmul.mubr.f32.gmra.mrb[8].mxu0 %v3327_v17  ;;  %3034 = vmatprep.mubr.msk.f32.mxu1 %vm3254_vm0, %v3253_v0 }
  0x84   : > { %1793 = vmatprep.mubr.f32.mxu0 %v3253_v0 }
  0x86   : > { %3035 = vmatmul.mubr.f32.gmra.mrb[10].mxu1 %v3330_v18 }
  0x87   : > { %1796 = vmatmul.mubr.f32.gmra.mrb[10].mxu0 %v3330_v18  ;;  %3039 = vmatprep.mubr.msk.f32.mxu1 %vm3254_vm0, %v3253_v0 }
  0x88   : > { %1868 = vmatprep.mubr.f32.mxu0 %v3253_v0 }
  0x8a   : > { %3040 = vmatmul.mubr.f32.vlgmr.msra.gmra.mrb[6].mxu1 %v3340_v23 }
  0x8b   : > { %1872 = vmatmul.mubr.f32.vlgmr.msra.gmra.mrb[6].mxu0 %v3340_v23  ;;  %3042 = vmatprep.mubr.msk.f32.mxu1 %vm3254_vm0, %v3253_v0 }
  0x8c   : > { %1877 = vmatprep.mubr.f32.mxu0 %v3253_v0  ;;  %1903 = vmatpush1.msra.mxu0 %v1621_v58 }
  0x8d   : > { %3049 = vmatpush3.msra.mxu1 %v2175_v59  ;;  %1989 = vmatprep.subr.mxu0 %v3457_v48 }
  0x8e   : > { %3043 = vmatmul.mubr.f32.gmra.mrb[8].mxu1 %v3343_v24  ;;  %3059 = vmatprep.subr.mxu1 %v3253_v0 }
  0x8f   : > { %1881 = vmatmul.mubr.f32.gmra.mrb[8].mxu0 %v3343_v24  ;;  %3045 = vmatprep.mubr.msk.f32.mxu1 %vm3254_vm0, %v3253_v0 }
  0x90   : > { %1886 = vmatprep.mubr.f32.mxu0 %v3253_v0 }
  0x92   : > { %3046 = vmatmul.mubr.f32.gmra.mrb[10].mxu1 %v3361_v30 }
  0x93   : > { %1890 = vmatmul.mubr.f32.gmra.mrb[10].mxu0 %v3361_v30  ;;  %3050 = vmatprep.mubr.msk.f32.mxu1 %vm3254_vm0, %v3253_v0 }
  0x94   : > { %1966 = vmatprep.mubr.f32.mxu0 %v3253_v0 }
  0x96   : > { %3051 = vmatmul.mubr.f32.vlgmr.msra.gmra.mrb[6].mxu1 %v3314_v10 }
  0x97   : > { %1968 = vmatmul.mubr.f32.vlgmr.msra.gmra.mrb[6].mxu0 %v3314_v10  ;;  %3053 = vmatprep.mubr.msk.f32.mxu1 %vm3254_vm0, %v3253_v0 }
  0x98   : > { %1973 = vmatprep.mubr.f32.mxu0 %v3253_v0  ;;  %1991 = vmatpush1.msra.mxu0 %v3483_v53 }
  0x99   : > { %3060 = vmatpush3.msra.mxu1 %v3489_v54 }
  0x9a   : > { %3054 = vmatmul.mubr.f32.gmra.mrb[8].mxu1 %v3316_v11 }
  0x9b   : > { %1975 = vmatmul.mubr.f32.gmra.mrb[8].mxu0 %v3316_v11  ;;  %3056 = vmatprep.mubr.msk.f32.mxu1 %vm3254_vm0, %v3253_v0 }
  0x9c   : > { %1980 = vmatprep.mubr.f32.mxu0 %v3253_v0 }
  0x9e   : > { %3057 = vmatmul.mubr.f32.gmra.mrb[10].mxu1 %v3318_v12 }
  0x9f   : > { %1982 = vmatmul.mubr.f32.gmra.mrb[10].mxu0 %v3318_v12  ;;  %3061 = vmatprep.mubr.msk.f32.mxu1 %vm3254_vm0, %v3253_v0 }
  0xa0   : > { %2054 = vmatprep.mubr.f32.mxu0 %v3253_v0 }
  0xa2   : > { %3062 = vmatmul.mubr.f32.vlgmr.msra.gmra.mrb[6].mxu1 %v3314_v10 }
  0xa3   : > { %2056 = vmatmul.mubr.f32.vlgmr.msra.gmra.mrb[6].mxu0 %v3314_v10  ;;  %3064 = vmatprep.mubr.msk.f32.mxu1 %vm3254_vm0, %v3253_v0 }
  0xa4   : > { %2061 = vmatprep.mubr.f32.mxu0 %v3253_v0 }
  0xa6   : > { %3065 = vmatmul.mubr.f32.gmra.mrb[8].mxu1 %v3316_v11 }
  0xa7   : > { %2063 = vmatmul.mubr.f32.gmra.mrb[8].mxu0 %v3316_v11  ;;  %3067 = vmatprep.mubr.msk.f32.mxu1 %vm3254_vm0, %v3253_v0 }
  0xa8   : > { %2068 = vmatprep.mubr.f32.mxu0 %v3253_v0 }
  0xaa   : > { %3068 = vmatmul.mubr.f32.gmra.mrb[10].mxu1 %v3318_v12 }
  0xab   : > { %2070 = vmatmul.mubr.f32.gmra.mrb[10].mxu0 %v3318_v12 }
 0x12d   : > { %v3631_v1 = vpop.f32.mrb[0].mxu1 }
 0x12e   : > { %v3633_v2 = vpop.f32.mrb[0].mxu0  ;;  %v2997_v3 = vpop.f32.mrb[1].mxu1  ;;  %v1333_v4 = vrot.slane %v3631_v1, 2  ;;  %v1351_v15 = vrot.slane %v3631_v1, 4  ;;  %v1369_v17 = vrot.slane %v3631_v1, 6 }
 0x12f   : > { %v3636_v5 = vpop.f32.mrb[1].mxu0  ;;  %v1331_v6 = vrot.slane %v3633_v2, 2  ;;  %v1349_v9 = vrot.slane %v3633_v2, 4  ;;  %v1367_v11 = vrot.slane %v3633_v2, 6 }
 0x130   : > { %1338 = vrot.lane.b32.xlu1 %v1333_v4, %s3255_s20  ;;  %v1368_v18 = vrot.slane %v3636_v5, 6  ;;  %v1332_v19 = vrot.slane %v3636_v5, 2  ;;  %v1350_v20 = vrot.slane %v3636_v5, 4 }
 0x131   : > { %1334 = vrot.lane.b32.xlu0 %v1331_v6, %s3255_s20  ;;  %v1318_v0 = vpop.f32.mrb[2].mxu1 }
 0x132   : > { %v784_v7 = vpop.f32.mrb[2].mxu0  ;;  %v3000_v8 = vpop.f32.mrb[3].mxu1  ;;  %v1405_v25 = vrot.slane %v1318_v0, 2  ;;  %v1423_v27 = vrot.slane %v1318_v0, 4  ;;  %v1441_v29 = vrot.slane %v1318_v0, 6 }
 0x133   : > { %v786_v10 = vpop.f32.mrb[3].mxu0  ;;  %v1403_v24 = vrot.slane %v784_v7, 2  ;;  %v1421_v26 = vrot.slane %v784_v7, 4  ;;  %v1439_v28 = vrot.slane %v784_v7, 6 }
 0x134   : > { %1352 = vrot.lane.b32.xlu1 %v1349_v9, %s3256_s21  ;;  %v1404_v21 = vrot.slane %v786_v10, 2  ;;  %v1422_v22 = vrot.slane %v786_v10, 4  ;;  %v1440_v23 = vrot.slane %v786_v10, 6 }
 0x135   : > { %1370 = vrot.lane.b32.xlu0 %v1367_v11, %s3257_s22  ;;  %v1324_v12 = vpop.f32.mrb[4].mxu1 }
 0x136   : > { %v791_v13 = vpop.f32.mrb[4].mxu0  ;;  %v3003_v14 = vpop.f32.mrb[5].mxu1 }
 0x137   : > { %v793_v16 = vpop.f32.mrb[5].mxu0 }
 0x138   : > { %1356 = vrot.lane.b32.xlu1 %v1351_v15, %s3256_s21 }
 0x139   : > { %1374 = vrot.lane.b32.xlu0 %v1369_v17, %s3257_s22 }
 0x13c   : > { %1372 = vrot.lane.b32.xlu1 %v1368_v18, %s3257_s22 }
 0x13d   : > { %1336 = vrot.lane.b32.xlu0 %v1332_v19, %s3255_s20 }
 0x140   : > { %1390 = vrot.lane.b32.xlu1 %v786_v10, %s3258_s23 }
 0x141   : > { %1354 = vrot.lane.b32.xlu0 %v1350_v20, %s3256_s21 }
 0x144   : > { %1408 = vrot.lane.b32.xlu1 %v1404_v21, %s3259_s24 }
 0x145   : > { %1388 = vrot.lane.b32.xlu0 %v784_v7, %s3258_s23 }
 0x148   : > { %1426 = vrot.lane.b32.xlu1 %v1422_v22, %s3260_s25 }
 0x149   : > { %1392 = vrot.lane.b32.xlu0 %v1318_v0, %s3258_s23 }
 0x14c   : > { %1444 = vrot.lane.b32.xlu1 %v1440_v23, %s3261_s26 }
 0x14d   : > { %1406 = vrot.lane.b32.xlu0 %v1403_v24, %s3259_s24 }
 0x150   : > { %1462 = vrot.lane.b32.xlu1 %v793_v16, %s3262_s27 }
 0x151   : > { %1410 = vrot.lane.b32.xlu0 %v1405_v25, %s3259_s24 }
 0x155   : > { %1424 = vrot.lane.b32.xlu0 %v1421_v26, %s3260_s25 }
 0x159   : > { %1428 = vrot.lane.b32.xlu0 %v1423_v27, %s3260_s25 }
 0x15d   : > { %1442 = vrot.lane.b32.xlu0 %v1439_v28, %s3261_s26 }
 0x161   : > { %1446 = vrot.lane.b32.xlu0 %v1441_v29, %s3261_s26 }
 0x165   : > { %1460 = vrot.lane.b32.xlu0 %v791_v13, %s3262_s27 }
 0x169   : > { %1464 = vrot.lane.b32.xlu0 %v1324_v12, %s3262_s27 }
 0x175   : > { %v3670_v30 = vpop.f32.mrb[6].mxu1 }
 0x176   : > { %v3672_v31 = vpop.f32.mrb[6].mxu0  ;;  %v3063_v32 = vpop.f32.mrb[7].mxu1  ;;  %v2630_v40 = vrot.slane %v3670_v30, 4  ;;  %v2613_v41 = vrot.slane %v3670_v30, 2  ;;  %v2647_v48 = vrot.slane %v3670_v30, 6 }
 0x177   : > { %v3674_v33 = vpop.f32.mrb[7].mxu0  ;;  %v2628_v34 = vrot.slane %v3672_v31, 4  ;;  %v2611_v35 = vrot.slane %v3672_v31, 2  ;;  %v2645_v46 = vrot.slane %v3672_v31, 6 }
 0x178   : > { %v2629_v47 = vrot.slane %v3674_v33, 4  ;;  %v2646_v49 = vrot.slane %v3674_v33, 6  ;;  %v2612_v50 = vrot.slane %v3674_v33, 2 }
 0x179   : > { %2631 = vrot.lane.b32.xlu1 %v2628_v34, %s3256_s21  ;;  %2614 = vrot.lane.b32.xlu0 %v2611_v35, %s3255_s20  ;;  %v2598_v36 = vpop.f32.mrb[8].mxu1 }
 0x17a   : > { %v2064_v37 = vpop.f32.mrb[8].mxu0  ;;  %v3066_v38 = vpop.f32.mrb[9].mxu1  ;;  %v2681_v55 = vrot.slane %v2598_v36, 2  ;;  %v2698_v57 = vrot.slane %v2598_v36, 4  ;;  %v2715_v61 = vrot.slane %v2598_v36, 6 }
 0x17b   : > { %v2066_v39 = vpop.f32.mrb[9].mxu0  ;;  %v2679_v53 = vrot.slane %v2064_v37, 2  ;;  %v2696_v56 = vrot.slane %v2064_v37, 4  ;;  %v2713_v59 = vrot.slane %v2064_v37, 6 }
 0x17c   : > { %v2680_v51 = vrot.slane %v2066_v39, 2  ;;  %v2697_v52 = vrot.slane %v2066_v39, 4  ;;  %v2714_v54 = vrot.slane %v2066_v39, 6 }
 0x17d   : > { %2635 = vrot.lane.b32.xlu1 %v2630_v40, %s3256_s21  ;;  %2618 = vrot.lane.b32.xlu0 %v2613_v41, %s3255_s20  ;;  %v2604_v42 = vpop.f32.mrb[10].mxu1 }
 0x17e   : > { %v2071_v43 = vpop.f32.mrb[10].mxu0  ;;  %v3069_v44 = vpop.f32.mrb[11].mxu1 }
 0x17f   : > { %v2073_v45 = vpop.f32.mrb[11].mxu0  ;;  %v1482_v44 = vlaneseq }
 0x181   : > { %2648 = vrot.lane.b32.xlu1 %v2645_v46, %s3257_s22  ;;  %2633 = vrot.lane.b32.xlu0 %v2629_v47, %s3256_s21 }
 0x185   : > { %2652 = vrot.lane.b32.xlu1 %v2647_v48, %s3257_s22  ;;  %2650 = vrot.lane.b32.xlu0 %v2646_v49, %s3257_s22 }
 0x189   : > { %2616 = vrot.lane.b32.xlu1 %v2612_v50, %s3255_s20  ;;  %2667 = vrot.lane.b32.xlu0 %v2066_v39, %s3258_s23  ;;  %v3263_v39 = vmov 1983009808  }
 0x18a   : > { %v1480_v40 = vunpack.c.l.s4 %v3263_v39 }
 0x18d   : > { %2665 = vrot.lane.b32.xlu1 %v2064_v37, %s3258_s23  ;;  %2684 = vrot.lane.b32.xlu0 %v2680_v51, %s3259_s24 }
 0x191   : > { %2669 = vrot.lane.b32.xlu1 %v2598_v36, %s3258_s23  ;;  %2701 = vrot.lane.b32.xlu0 %v2697_v52, %s3260_s25 }
 0x195   : > { %2682 = vrot.lane.b32.xlu1 %v2679_v53, %s3259_s24  ;;  %2718 = vrot.lane.b32.xlu0 %v2714_v54, %s3261_s26  ;;  %v1481_v53 = vunpack.c.0.s8 %v1480_v40 }
 0x199   : > { %2686 = vrot.lane.b32.xlu1 %v2681_v55, %s3259_s24  ;;  %2735 = vrot.lane.b32.xlu0 %v2073_v45, %s3262_s27 }
 0x19d   : > { %2699 = vrot.lane.b32.xlu1 %v2696_v56, %s3260_s25 }
 0x1a1   : > { %2703 = vrot.lane.b32.xlu1 %v2698_v57, %s3260_s25 }
 0x1a2   : > { %v1339_v62 = vpop.permute.xlu1 %1338 }
 0x1a3   : > { %v1335_v58 = vpop.permute.xlu0 %1334  ;;  %v1348_v21 = vadd.f32 %v1339_v62, %v3631_v1 }
 0x1a5   : > { %2716 = vrot.lane.b32.xlu1 %v2713_v59, %s3261_s26 }
 0x1a6   : > { %v1353_v3 = vpop.permute.xlu1 %1352 }
 0x1a7   : > { %v1371_v60 = vpop.permute.xlu0 %1370 }
 0x1a9   : > { %2720 = vrot.lane.b32.xlu1 %v2715_v61, %s3261_s26 }
 0x1aa   : > { %v1357_v0 = vpop.permute.xlu1 %1356 }
 0x1ab   : > { %v1375_v63 = vpop.permute.xlu0 %1374  ;;  %v1366_v25 = vadd.f32 %v1357_v0, %v1348_v21 }
 0x1ad   : > { %2733 = vrot.lane.b32.xlu1 %v2071_v43, %s3262_s27  ;;  %v1384_v1 = vadd.f32 %v1375_v63, %v1366_v25 }
 0x1ae   : > { %v1373_v8 = vpop.permute.xlu1 %1372 }
 0x1af   : > { %v1337_v4 = vpop.permute.xlu0 %1336  ;;  %v1377_v28 = vsel %vm1376_vm5, %v1371_v60, %v1373_v8 }
 0x1b0   : > { %v1341_v15 = vsel %vm1340_vm3, %v1335_v58, %v1337_v4  ;;  %v1342_v16 = vsel %vm1340_vm3, %v1337_v4, %v1339_v62  ;;  %v1483_v58 = vshrl.u32 %v1482_v44, 7 }
 0x1b1   : > { %2737 = vrot.lane.b32.xlu1 %v2604_v42, %s3262_s27  ;;  %v1346_v18 = vadd.f32 %v1341_v15, %v3633_v2  ;;  %v1347_v22 = vadd.f32 %v1342_v16, %v3636_v5  ;;  %v1378_v2 = vsel %vm1376_vm5, %v1373_v8, %v1375_v63 }
 0x1b2   : > { %v1391_v11 = vpop.permute.xlu1 %1390 }
 0x1b3   : > { %v1355_v6 = vpop.permute.xlu0 %1354 }
 0x1b4   : > { %v1359_v17 = vsel %vm1358_vm4, %v1353_v3, %v1355_v6  ;;  %v1360_v20 = vsel %vm1358_vm4, %v1355_v6, %v1357_v0  ;;  %v3728_v6 = vsub.s32 %v1481_v53, %v1483_v58 }
 0x1b5   : > { %v1364_v23 = vadd.f32 %v1359_v17, %v1346_v18  ;;  %v1365_v26 = vadd.f32 %v1360_v20, %v1347_v22 }
 0x1b6   : > { %v1409_v13 = vpop.permute.xlu1 %1408 }
 0x1b7   : > { %v1389_v7 = vpop.permute.xlu0 %1388  ;;  %v1382_v29 = vadd.f32 %v1377_v28, %v1364_v23  ;;  %v1383_v35 = vadd.f32 %v1378_v2, %v1365_v26 }
 0x1b8   : > { %v1395_v32 = vsel %vm1394_vm6, %v1389_v7, %v1391_v11 }
 0x1b9   : > { %v1400_v41 = vadd.f32 %v1395_v32, %v1382_v29 }
 0x1ba   : > { %v1427_v24 = vpop.permute.xlu1 %1426 }
 0x1bb   : > { %v1393_v9 = vpop.permute.xlu0 %1392 }
 0x1bc   : > { %v1396_v34 = vsel %vm1394_vm6, %v1391_v11, %v1393_v9  ;;  %v1402_v43 = vadd.f32 %v1393_v9, %v1384_v1 }
 0x1bd   : > { %v1401_v42 = vadd.f32 %v1396_v34, %v1383_v35 }
 0x1be   : > { %v1445_v36 = vpop.permute.xlu1 %1444 }
 0x1bf   : > { %v1407_v10 = vpop.permute.xlu0 %1406 }
 0x1c0   : > { %v1413_v37 = vsel %vm1412_vm7, %v1407_v10, %v1409_v13 }
 0x1c1   : > { %v1418_v47 = vadd.f32 %v1413_v37, %v1400_v41 }
 0x1c2   : > { %v1463_v54 = vpop.permute.xlu1 %1462 }
 0x1c3   : > { %v1411_v12 = vpop.permute.xlu0 %1410 }
 0x1c4   : > { %v1414_v38 = vsel %vm1412_vm7, %v1409_v13, %v1411_v12  ;;  %v1420_v49 = vadd.f32 %v1411_v12, %v1402_v43 }
 0x1c5   : > { %v1419_v48 = vadd.f32 %v1414_v38, %v1401_v42 }
 0x1c7   : > { %v1425_v14 = vpop.permute.xlu0 %1424 }
 0x1c8   : > { %v1431_v45 = vsel %vm1430_vm8, %v1425_v14, %v1427_v24 }
 0x1c9   : > { %v1436_v55 = vadd.f32 %v1431_v45, %v1418_v47 }
 0x1cb   : > { %v1429_v19 = vpop.permute.xlu0 %1428 }
 0x1cc   : > { %v1432_v46 = vsel %vm1430_vm8, %v1427_v24, %v1429_v19  ;;  %v1438_v57 = vadd.f32 %v1429_v19, %v1420_v49 }
 0x1cd   : > { %v1437_v56 = vadd.f32 %v1432_v46, %v1419_v48 }
 0x1cf   : > { %v1443_v27 = vpop.permute.xlu0 %1442 }
 0x1d0   : > { %v1449_v51 = vsel %vm1448_vm9, %v1443_v27, %v1445_v36 }
 0x1d1   : > { %v1454_v60 = vadd.f32 %v1449_v51, %v1436_v55 }
 0x1d3   : > { %v1447_v5 = vpop.permute.xlu0 %1446 }
 0x1d4   : > { %v1450_v52 = vsel %vm1448_vm9, %v1445_v36, %v1447_v5  ;;  %v1456_v62 = vadd.f32 %v1447_v5, %v1438_v57 }
 0x1d5   : > { %v1455_v61 = vadd.f32 %v1450_v52, %v1437_v56 }
 0x1d7   : > { %v1461_v50 = vpop.permute.xlu0 %1460 }
 0x1d8   : > { %v1467_v59 = vsel %vm1466_vm10, %v1461_v50, %v1463_v54 }
 0x1d9   : > { %v1472_v4 = vadd.f32 %v1467_v59, %v1454_v60 }
 0x1db   : > { %v1465_v63 = vpop.permute.xlu0 %1464 }
 0x1dc   : > { %v1468_v3 = vsel %vm1466_vm10, %v1463_v54, %v1465_v63  ;;  %v1474_v7 = vadd.f32 %v1465_v63, %v1456_v62 }
 0x1dd   : > { %v1473_v0 = vadd.f32 %v1468_v3, %v1455_v61 }
 0x1de   : > { %v1492_v10 = vrot.slane %v1474_v7, %v3728_v6 }
 0x1df   : > { %v1478_v8 = vcombine.low %v1472_v4, %v1473_v0 }
 0x1e1   : > { %v1485_v9 = vrot.slane %v1478_v8, %v3728_v6 }
 0x1e3   : > { %v1493_v12 = vcombine.low %v1485_v9, %v1492_v10 }
 0x1e5   : > { %1500 = vst.msk [vmem:[%s3736_s3] sm:$0x3f] %vm3738_vm15, %v1493_v12 }
 0x1eb   : > { %v2632_v13 = vpop.permute.xlu1 %2631  ;;  %v2615_v14 = vpop.permute.xlu0 %2614 }
 0x1ef   : > { %v2636_v15 = vpop.permute.xlu1 %2635  ;;  %v2619_v17 = vpop.permute.xlu0 %2618 }
 0x1f0   : > { %v2627_v38 = vadd.f32 %v2619_v17, %v3670_v30 }
 0x1f2   : > { %v2644_v40 = vadd.f32 %v2636_v15, %v2627_v38 }
 0x1f3   : > { %v2649_v16 = vpop.permute.xlu1 %2648  ;;  %v2634_v19 = vpop.permute.xlu0 %2633 }
 0x1f4   : > { %v2637_v25 = vsel %vm1358_vm4, %v2632_v13, %v2634_v19  ;;  %v2638_v26 = vsel %vm1358_vm4, %v2634_v19, %v2636_v15 }
 0x1f7   : > { %v2653_v18 = vpop.permute.xlu1 %2652  ;;  %v2651_v2 = vpop.permute.xlu0 %2650 }
 0x1f8   : > { %v2655_v42 = vsel %vm1376_vm5, %v2651_v2, %v2653_v18  ;;  %v2661_v44 = vadd.f32 %v2653_v18, %v2644_v40 }
 0x1fb   : > { %v2617_v20 = vpop.permute.xlu1 %2616  ;;  %v2668_v1 = vpop.permute.xlu0 %2667 }
 0x1fc   : > { %v2620_v21 = vsel %vm1340_vm3, %v2615_v14, %v2617_v20  ;;  %v2621_v22 = vsel %vm1340_vm3, %v2617_v20, %v2619_v17 }
 0x1fd   : > { %v2625_v23 = vadd.f32 %v2620_v21, %v3672_v31  ;;  %v2626_v24 = vadd.f32 %v2621_v22, %v3674_v33  ;;  %v2654_v33 = vsel %vm1376_vm5, %v2649_v16, %v2651_v2 }
 0x1ff   : > { %v2642_v27 = vadd.f32 %v2637_v25, %v2625_v23  ;;  %v2643_v28 = vadd.f32 %v2638_v26, %v2626_v24  ;;  %v2666_v29 = vpop.permute.xlu1 %2665  ;;  %v2685_v36 = vpop.permute.xlu0 %2684 }
 0x200   : > { %v2671_v48 = vsel %vm1394_vm6, %v2666_v29, %v2668_v1 }
 0x201   : > { %v2659_v41 = vadd.f32 %v2654_v33, %v2642_v27  ;;  %v2660_v45 = vadd.f32 %v2655_v42, %v2643_v28 }
 0x203   : > { %v2670_v32 = vpop.permute.xlu1 %2669  ;;  %v2702_v31 = vpop.permute.xlu0 %2701  ;;  %v2676_v50 = vadd.f32 %v2671_v48, %v2659_v41 }
 0x204   : > { %v2672_v43 = vsel %vm1394_vm6, %v2668_v1, %v2670_v32  ;;  %v2678_v52 = vadd.f32 %v2670_v32, %v2661_v44 }
 0x205   : > { %v2677_v51 = vadd.f32 %v2672_v43, %v2660_v45 }
 0x207   : > { %v2683_v34 = vpop.permute.xlu1 %2682  ;;  %v2719_v46 = vpop.permute.xlu0 %2718 }
 0x208   : > { %v2688_v49 = vsel %vm1412_vm7, %v2683_v34, %v2685_v36 }
 0x209   : > { %v2693_v55 = vadd.f32 %v2688_v49, %v2676_v50 }
 0x20b   : > { %v2687_v35 = vpop.permute.xlu1 %2686  ;;  %v2736_v61 = vpop.permute.xlu0 %2735 }
 0x20c   : > { %v2689_v30 = vsel %vm1412_vm7, %v2685_v36, %v2687_v35  ;;  %v2695_v57 = vadd.f32 %v2687_v35, %v2678_v52 }
 0x20d   : > { %v2694_v56 = vadd.f32 %v2689_v30, %v2677_v51 }
 0x20f   : > { %v2700_v5 = vpop.permute.xlu1 %2699 }
 0x210   : > { %v2705_v53 = vsel %vm1430_vm8, %v2700_v5, %v2702_v31 }
 0x211   : > { %v2710_v62 = vadd.f32 %v2705_v53, %v2693_v55 }
 0x213   : > { %v2704_v37 = vpop.permute.xlu1 %2703 }
 0x214   : > { %v2706_v54 = vsel %vm1430_vm8, %v2702_v31, %v2704_v37  ;;  %v2712_v3 = vadd.f32 %v2704_v37, %v2695_v57 }
 0x215   : > { %v2711_v63 = vadd.f32 %v2706_v54, %v2694_v56 }
 0x217   : > { %v2717_v39 = vpop.permute.xlu1 %2716 }
 0x218   : > { %v2722_v59 = vsel %vm1448_vm9, %v2717_v39, %v2719_v46 }
 0x219   : > { %v2727_v0 = vadd.f32 %v2722_v59, %v2710_v62 }
 0x21b   : > { %v2721_v47 = vpop.permute.xlu1 %2720 }
 0x21c   : > { %v2723_v60 = vsel %vm1448_vm9, %v2719_v46, %v2721_v47  ;;  %v2729_v8 = vadd.f32 %v2721_v47, %v2712_v3 }
 0x21d   : > { %v2728_v7 = vadd.f32 %v2723_v60, %v2711_v63 }
 0x21f   : > { %v2734_v58 = vpop.permute.xlu1 %2733 }
 0x220   : > { %v2739_v4 = vsel %vm1466_vm10, %v2734_v58, %v2736_v61 }
 0x221   : > { %v2744_v12 = vadd.f32 %v2739_v4, %v2727_v0 }
 0x223   : > { %v2738_v9 = vpop.permute.xlu1 %2737 }
 0x224   : > { %v2740_v10 = vsel %vm1466_vm10, %v2736_v61, %v2738_v9  ;;  %v2746_v14 = vadd.f32 %v2738_v9, %v2729_v8 }
 0x225   : > { %v2745_v13 = vadd.f32 %v2740_v10, %v2728_v7 }
 0x226   : > { %v2764_v17 = vrot.slane %v2746_v14, %v3728_v6 }
 0x227   : > { %v2750_v15 = vcombine.low %v2744_v12, %v2745_v13 }
 0x229   : > { %v2757_v16 = vrot.slane %v2750_v15, %v3728_v6 }
 0x22b   : > { %v2765_v18 = vcombine.low %v2757_v16, %v2764_v17 }
 0x22d   : > { %2887 = vst.msk [vmem:[%s3736_s3 + $0x6] sm:$0x3f] %vm3738_vm15, %v2765_v18 }
 0x22e PF: > { %s12_s11 = sadd.s32 1, %s3251_s11   ;;  %s3783_s9 = smov %s3247_s10 }
 0x22f   : > { %p9_p5 = scmp.ge.s32.totalorder %s12_s11, 5   ;;  %s3784_s10 = smov %s3786_s12 }
 0x231   :  { %11 = sbr.rel (!%p9_p5) target bundleno = 2 (0x2), region = 63 }

</bundles_post_ra>
